<compile_context>
chip_gen: v5e
topology: v5e:2x2
jax: 0.10.0
libtpu: 0.0.40
codegen_flags: <defaults>
</compile_context>

<pallas_src>
import functools

import jax
import jax.numpy as jnp
from jax import lax
from jax.experimental import pallas as pl
from jax.experimental.pallas import tpu as pltpu


def _round_up(x, m):
    return (x + m - 1) // m * m


def _pick_tm(requested, seq_len, vocab_rows):
    """Largest multiple of 8 <= requested that divides the padded seq length."""
    s_pad = _round_up(seq_len, 8)
    # The aggregate-wait descriptor spans tm rows of the word table, so also
    # cap tm by the (rounded-down) vocab size — never binding for real configs.
    vocab_cap = (vocab_rows // 8) * 8 if vocab_rows >= 8 else 8
    cap = max(8, min(int(requested), s_pad, vocab_cap))
    best = 8
    for cand in range(8, cap + 1, 8):
        if s_pad % cand == 0:
            best = cand
    return best, s_pad


def _bert_emb_kernel(ids_ref,                          # scalar prefetch: flat word ids (SMEM)
                     word_hbm,                         # word table in HBM (pl.ANY)
                     pos_ref,                          # (TM, H) position rows (VMEM, pipelined)
                     tt_ref,                           # (TM, 1) token-type ids (VMEM)
                     type_tab_ref,                     # (T, H) token-type table (VMEM, resident)
                     gamma_ref, beta_ref,              # (1, H) LayerNorm params
                     out_ref,                          # (TM, H) output tile
                     wbuf, sem,                        # (TM, H) landing buffer + DMA semaphore
                     *, tm, eps, unroll):
    i = pl.program_id(0)
    h = out_ref.shape[-1]
    base_tok = i * tm

    # ---- 1. issue TM word-row gathers (partially unrolled descriptor issue) ----
    @pl.loop(0, tm // unroll)
    def _issue(r):
        b = pl.multiple_of(r * unroll, unroll)
        for u in range(unroll):                        # static inner unroll
            tok = base_tok + b + u
            pltpu.make_async_copy(word_hbm.at[ids_ref[tok]],
                                  wbuf.at[b + u],
                                  sem.at[0]).start()

    # ---- 2. work that does not need the gathered rows (hides DMA latency) ----
    # token-type embedding: direct select chain over the VMEM-resident table.
    tt = tt_ref[...]                                   # (TM, 1) int32
    n_types = type_tab_ref.shape[0]
    sel = jnp.broadcast_to(
        type_tab_ref[n_types - 1, :].astype(jnp.float32)[None, :], (tm, h))
    for t in range(n_types - 2, -1, -1):               # static & tiny (e.g. 2 types)
        row = type_tab_ref[t, :].astype(jnp.float32)[None, :]
        sel = jnp.where(tt == t, row, sel)
    pre = sel + pos_ref[...].astype(jnp.float32)       # token_type + position

    # ---- 3. single aggregate wait: same total bytes as the TM issued copies ----
    pltpu.make_async_copy(word_hbm.at[pl.ds(0, tm)], wbuf, sem.at[0]).wait()

    # ---- 4. sum + LayerNorm over the hidden axis, in f32 ----
    e = wbuf[...].astype(jnp.float32) + pre
    mean = jnp.mean(e, axis=-1, keepdims=True)
    c = e - mean
    var = jnp.mean(c * c, axis=-1, keepdims=True)
    inv = lax.rsqrt(var + eps)
    out_ref[...] = (c * inv * gamma_ref[...].astype(jnp.float32)
                    + beta_ref[...].astype(jnp.float32)).astype(out_ref.dtype)
    # TODO(synk): nn.Dropout is identity in eval mode; training-mode dropout
    # (pltpu.prng_random_bits mask) intentionally omitted.


def bert_embeddings(input_ids, word_emb, pos_emb, type_emb, gamma, beta,
                    token_type_ids=None, position_ids=None,
                    past_key_values_length=0, *, eps=1e-12, tm=256):
    B, S = input_ids.shape
    H = word_emb.shape[1]

    tm, S_pad = _pick_tm(tm, S, word_emb.shape[0])
    tiles_per_row = S_pad // tm
    n_pad = B * S_pad
    grid = B * tiles_per_row

    def pad_rows(x):
        x = x.astype(jnp.int32)
        return jnp.pad(x, ((0, 0), (0, S_pad - S))).reshape(-1)

    ids_flat = pad_rows(input_ids)

    if token_type_ids is None:
        token_type_ids = jnp.zeros((B, S), jnp.int32)
    tt2d = pad_rows(token_type_ids).reshape(n_pad, 1)

    if position_ids is None:
        # Default arange positions (PyTorch buffer path): each tile's rows are a
        # contiguous slice of the small position table -> auto-pipelined
        # BlockSpec, no per-row gather DMAs at all.
        p0 = int(past_key_values_length)
        pos_slab = jnp.pad(pos_emb[p0:p0 + S], ((0, S_pad - S), (0, 0)))
        pos_index_map = lambda i, ids: (i % tiles_per_row, 0)
    else:
        # TODO(synk): arbitrary position_ids use a wrapper-side gather slab
        # (one extra N*H HBM write+read) instead of per-row DMAs in the kernel.
        pos_slab = jnp.take(pos_emb, pad_rows(position_ids), axis=0)
        pos_index_map = lambda i, ids: (i, 0)

    gamma2 = gamma.reshape(1, H)        # keep stored dtype; cast in-kernel
    beta2 = beta.reshape(1, H)
    out_dtype = word_emb.dtype

    grid_spec = pltpu.PrefetchScalarGridSpec(
        num_scalar_prefetch=1,
        grid=(grid,),
        in_specs=[
            pl.BlockSpec(memory_space=pl.ANY),                     # word table (HBM)
            pl.BlockSpec((tm, H), pos_index_map),                  # position rows (pipelined)
            pl.BlockSpec((tm, 1), lambda i, ids: (i, 0)),          # token-type ids tile
            pl.BlockSpec(type_emb.shape, lambda i, ids: (0, 0)),   # token-type table (resident)
            pl.BlockSpec((1, H), lambda i, ids: (0, 0)),           # gamma
            pl.BlockSpec((1, H), lambda i, ids: (0, 0)),           # beta
        ],
        out_specs=pl.BlockSpec((tm, H), lambda i, ids: (i, 0)),
        scratch_shapes=[
            pltpu.VMEM((tm, H), word_emb.dtype),    # word-row landing buffer
            pltpu.SemaphoreType.DMA((1,)),          # one aggregate DMA semaphore
        ],
    )

    isz = lambda a: jnp.dtype(a.dtype).itemsize
    cost = pl.CostEstimate(
        flops=10 * n_pad * H,
        transcendentals=n_pad,
        bytes_accessed=(n_pad * H * (isz(word_emb) + isz(pos_slab)
                                     + jnp.dtype(out_dtype).itemsize)
                        + 2 * n_pad * 4                        # word ids + token-type ids
                        + type_emb.size * isz(type_emb)        # token-type table
                        + 2 * H * 4),                          # gamma + beta
    )

    out = pl.pallas_call(
        functools.partial(_bert_emb_kernel, tm=tm, eps=eps, unroll=8),
        out_shape=jax.ShapeDtypeStruct((n_pad, H), out_dtype),
        grid_spec=grid_spec,
        compiler_params=pltpu.CompilerParams(
            # Each grid step is self-contained (issue + aggregate wait in-step),
            # so the axis can be split across v7x's two TensorCores.
            dimension_semantics=("parallel",)),
        cost_estimate=cost,
    )(ids_flat, word_emb, pos_slab, tt2d, type_emb, gamma2, beta2)

    return out.reshape(B, S_pad, H)[:, :S, :]


def _reference(input_ids, token_type_ids, position_ids,
               word_emb, pos_emb, type_emb, gamma, beta, eps=1e-12):
    e = word_emb[input_ids] + type_emb[token_type_ids] + pos_emb[position_ids]
    mean = jnp.mean(e, axis=-1, keepdims=True)
    var = jnp.mean((e - mean) ** 2, axis=-1, keepdims=True)
    return (e - mean) / jnp.sqrt(var + eps) * gamma + beta


if __name__ == "__main__":
    # Small synthetic "config".
    vocab_size = 64
    hidden_size = 32
    max_position_embeddings = 16
    type_vocab_size = 2
    pad_token_id = 0
    layer_norm_eps = 1e-12

    B, S = 2, 8

    key = jax.random.PRNGKey(0)
    k_w, k_p, k_t, k_ids = jax.random.split(key, 4)

    # Deterministic parameter init (BERT-style: N(0, 0.02), zero pad row).
    word_emb = 0.02 * jax.random.normal(k_w, (vocab_size, hidden_size), jnp.float32)
    word_emb = word_emb.at[pad_token_id].set(0.0)
    pos_emb = 0.02 * jax.random.normal(k_p, (max_position_embeddings, hidden_size), jnp.float32)
    type_emb = 0.02 * jax.random.normal(k_t, (type_vocab_size, hidden_size), jnp.float32)
    gamma = jnp.ones((hidden_size,), jnp.float32)
    beta = jnp.zeros((hidden_size,), jnp.float32)

    input_ids = jax.random.randint(k_ids, (B, S), 0, vocab_size, dtype=jnp.int32)
    # Non-trivial token types to exercise the in-kernel select chain; positions
    # use the default arange path inside the wrapper (position_ids=None).
    token_type_ids = jnp.broadcast_to(
        (jnp.arange(S) >= S // 2).astype(jnp.int32)[None, :], (B, S))

    out = bert_embeddings(input_ids, word_emb, pos_emb, type_emb, gamma, beta,
                          token_type_ids=token_type_ids, eps=layer_norm_eps)
    out = jax.block_until_ready(out)

    position_ids = jnp.broadcast_to(jnp.arange(S, dtype=jnp.int32)[None, :], (B, S))
    ref = _reference(input_ids, token_type_ids, position_ids,
                     word_emb, pos_emb, type_emb, gamma, beta, layer_norm_eps)
    assert out.shape == (B, S, hidden_size)
    assert jnp.allclose(out, ref, atol=1e-5, rtol=1e-5), "mismatch vs reference"
    print("KERNEL_OK")
</pallas_src>

<mosaic_0001>
module attributes {stable_mosaic.version = 11 : i64} {
  func.func @_bert_emb_kernel(%arg0: i32, %arg1: memref<16xi32, #tpu.memory_space<smem>>, %arg2: memref<64x32xf32, #tpu.memory_space<any>>, %arg3: memref<8x32xf32, #tpu.memory_space<vmem>>, %arg4: memref<8x1xi32, #tpu.memory_space<vmem>>, %arg5: memref<2x32xf32, #tpu.memory_space<vmem>>, %arg6: memref<1x32xf32, #tpu.memory_space<vmem>>, %arg7: memref<1x32xf32, #tpu.memory_space<vmem>>, %arg8: memref<8x32xf32, #tpu.memory_space<vmem>>, %arg9: memref<8x32xf32, #tpu.memory_space<vmem>>, %arg10: memref<1x!tpu.dma_semaphore, #tpu.memory_space<semaphore_mem>>) attributes {dimension_semantics = [#tpu.dimension_semantics<parallel>], iteration_bounds = array<i64: 2>, scalar_prefetch = 1 : i64, scratch_operands = 2 : i64, tpu.core_type = #tpu.core_type<tc>, window_params = [{}, {transform_indices = @transform_1, window_bounds = array<i64: 8, 32>}, {transform_indices = @transform_2, window_bounds = array<i64: 8, 1>}, {pipeline_mode = #tpu.pipeline_mode<synchronous>, transform_indices = @transform_3, window_bounds = array<i64: 2, 32>}, {pipeline_mode = #tpu.pipeline_mode<synchronous>, transform_indices = @transform_4, window_bounds = array<i64: 1, 32>}, {pipeline_mode = #tpu.pipeline_mode<synchronous>, transform_indices = @transform_5, window_bounds = array<i64: 1, 32>}, {transform_indices = @transform_6, window_bounds = array<i64: 8, 32>}]} {
    %c8_i32 = arith.constant 8 : i32
    %0 = arith.muli %arg0, %c8_i32 : i32
    %c0_i32 = arith.constant 0 : i32
    %c1_i32 = arith.constant 1 : i32
    %1 = arith.muli %c0_i32, %c1_i32 : i32
    %c0_i32_0 = arith.constant 0 : i32
    %2 = arith.addi %c0_i32_0, %1 : i32
    %c8_i32_1 = arith.constant 8 : i32
    %3 = arith.muli %2, %c8_i32_1 : i32
    %4 = tpu.assume_multiple %3, 8 : i32
    %5 = arith.addi %0, %4 : i32
    %c0_i32_2 = arith.constant 0 : i32
    %6 = arith.addi %5, %c0_i32_2 : i32
    %7 = arith.index_cast %6 : i32 to index
    %8 = memref.load %arg1[%7] : memref<16xi32, #tpu.memory_space<smem>>
    %c0_i32_3 = arith.constant 0 : i32
    %9 = arith.addi %4, %c0_i32_3 : i32
    %c0_i32_4 = arith.constant 0 : i32
    %c0_i32_5 = arith.constant 0 : i32
    %10 = tpu.memref_slice %arg2[%8, %c0_i32_5] : memref<64x32xf32, #tpu.memory_space<any>> -> memref<1x32xf32, #tpu.memory_space<any>>
    %11 = tpu.memref_squeeze %10 : memref<1x32xf32, #tpu.memory_space<any>> -> memref<32xf32, #tpu.memory_space<any>>
    %c0_i32_6 = arith.constant 0 : i32
    %12 = tpu.memref_slice %arg9[%9, %c0_i32_6] : memref<8x32xf32, #tpu.memory_space<vmem>> -> memref<1x32xf32, #tpu.memory_space<vmem>>
    %13 = tpu.memref_squeeze %12 : memref<1x32xf32, #tpu.memory_space<vmem>> -> memref<32xf32, #tpu.memory_space<vmem>>
    %14 = tpu.memref_slice %arg10[%c0_i32_4] : memref<1x!tpu.dma_semaphore, #tpu.memory_space<semaphore_mem>> -> memref<1x!tpu.dma_semaphore, #tpu.memory_space<semaphore_mem>>
    %15 = tpu.memref_squeeze %14 : memref<1x!tpu.dma_semaphore, #tpu.memory_space<semaphore_mem>> -> memref<!tpu.dma_semaphore, #tpu.memory_space<semaphore_mem>>
    tpu.enqueue_dma source(%11 : memref<32xf32, #tpu.memory_space<any>>) target(%13 : memref<32xf32, #tpu.memory_space<vmem>>) target_semaphore(%15 : memref<!tpu.dma_semaphore, #tpu.memory_space<semaphore_mem>>)
    %16 = arith.addi %0, %4 : i32
    %c1_i32_7 = arith.constant 1 : i32
    %17 = arith.addi %16, %c1_i32_7 : i32
    %18 = arith.index_cast %17 : i32 to index
    %19 = memref.load %arg1[%18] : memref<16xi32, #tpu.memory_space<smem>>
    %c1_i32_8 = arith.constant 1 : i32
    %20 = arith.addi %4, %c1_i32_8 : i32
    %c0_i32_9 = arith.constant 0 : i32
    %c0_i32_10 = arith.constant 0 : i32
    %21 = tpu.memref_slice %arg2[%19, %c0_i32_10] : memref<64x32xf32, #tpu.memory_space<any>> -> memref<1x32xf32, #tpu.memory_space<any>>
    %22 = tpu.memref_squeeze %21 : memref<1x32xf32, #tpu.memory_space<any>> -> memref<32xf32, #tpu.memory_space<any>>
    %c0_i32_11 = arith.constant 0 : i32
    %23 = tpu.memref_slice %arg9[%20, %c0_i32_11] : memref<8x32xf32, #tpu.memory_space<vmem>> -> memref<1x32xf32, #tpu.memory_space<vmem>>
    %24 = tpu.memref_squeeze %23 : memref<1x32xf32, #tpu.memory_space<vmem>> -> memref<32xf32, #tpu.memory_space<vmem>>
    %25 = tpu.memref_slice %arg10[%c0_i32_9] : memref<1x!tpu.dma_semaphore, #tpu.memory_space<semaphore_mem>> -> memref<1x!tpu.dma_semaphore, #tpu.memory_space<semaphore_mem>>
    %26 = tpu.memref_squeeze %25 : memref<1x!tpu.dma_semaphore, #tpu.memory_space<semaphore_mem>> -> memref<!tpu.dma_semaphore, #tpu.memory_space<semaphore_mem>>
    tpu.enqueue_dma source(%22 : memref<32xf32, #tpu.memory_space<any>>) target(%24 : memref<32xf32, #tpu.memory_space<vmem>>) target_semaphore(%26 : memref<!tpu.dma_semaphore, #tpu.memory_space<semaphore_mem>>)
    %27 = arith.addi %0, %4 : i32
    %c2_i32 = arith.constant 2 : i32
    %28 = arith.addi %27, %c2_i32 : i32
    %29 = arith.index_cast %28 : i32 to index
    %30 = memref.load %arg1[%29] : memref<16xi32, #tpu.memory_space<smem>>
    %c2_i32_12 = arith.constant 2 : i32
    %31 = arith.addi %4, %c2_i32_12 : i32
    %c0_i32_13 = arith.constant 0 : i32
    %c0_i32_14 = arith.constant 0 : i32
    %32 = tpu.memref_slice %arg2[%30, %c0_i32_14] : memref<64x32xf32, #tpu.memory_space<any>> -> memref<1x32xf32, #tpu.memory_space<any>>
    %33 = tpu.memref_squeeze %32 : memref<1x32xf32, #tpu.memory_space<any>> -> memref<32xf32, #tpu.memory_space<any>>
    %c0_i32_15 = arith.constant 0 : i32
    %34 = tpu.memref_slice %arg9[%31, %c0_i32_15] : memref<8x32xf32, #tpu.memory_space<vmem>> -> memref<1x32xf32, #tpu.memory_space<vmem>>
    %35 = tpu.memref_squeeze %34 : memref<1x32xf32, #tpu.memory_space<vmem>> -> memref<32xf32, #tpu.memory_space<vmem>>
    %36 = tpu.memref_slice %arg10[%c0_i32_13] : memref<1x!tpu.dma_semaphore, #tpu.memory_space<semaphore_mem>> -> memref<1x!tpu.dma_semaphore, #tpu.memory_space<semaphore_mem>>
    %37 = tpu.memref_squeeze %36 : memref<1x!tpu.dma_semaphore, #tpu.memory_space<semaphore_mem>> -> memref<!tpu.dma_semaphore, #tpu.memory_space<semaphore_mem>>
    tpu.enqueue_dma source(%33 : memref<32xf32, #tpu.memory_space<any>>) target(%35 : memref<32xf32, #tpu.memory_space<vmem>>) target_semaphore(%37 : memref<!tpu.dma_semaphore, #tpu.memory_space<semaphore_mem>>)
    %38 = arith.addi %0, %4 : i32
    %c3_i32 = arith.constant 3 : i32
    %39 = arith.addi %38, %c3_i32 : i32
    %40 = arith.index_cast %39 : i32 to index
    %41 = memref.load %arg1[%40] : memref<16xi32, #tpu.memory_space<smem>>
    %c3_i32_16 = arith.constant 3 : i32
    %42 = arith.addi %4, %c3_i32_16 : i32
    %c0_i32_17 = arith.constant 0 : i32
    %c0_i32_18 = arith.constant 0 : i32
    %43 = tpu.memref_slice %arg2[%41, %c0_i32_18] : memref<64x32xf32, #tpu.memory_space<any>> -> memref<1x32xf32, #tpu.memory_space<any>>
    %44 = tpu.memref_squeeze %43 : memref<1x32xf32, #tpu.memory_space<any>> -> memref<32xf32, #tpu.memory_space<any>>
    %c0_i32_19 = arith.constant 0 : i32
    %45 = tpu.memref_slice %arg9[%42, %c0_i32_19] : memref<8x32xf32, #tpu.memory_space<vmem>> -> memref<1x32xf32, #tpu.memory_space<vmem>>
    %46 = tpu.memref_squeeze %45 : memref<1x32xf32, #tpu.memory_space<vmem>> -> memref<32xf32, #tpu.memory_space<vmem>>
    %47 = tpu.memref_slice %arg10[%c0_i32_17] : memref<1x!tpu.dma_semaphore, #tpu.memory_space<semaphore_mem>> -> memref<1x!tpu.dma_semaphore, #tpu.memory_space<semaphore_mem>>
    %48 = tpu.memref_squeeze %47 : memref<1x!tpu.dma_semaphore, #tpu.memory_space<semaphore_mem>> -> memref<!tpu.dma_semaphore, #tpu.memory_space<semaphore_mem>>
    tpu.enqueue_dma source(%44 : memref<32xf32, #tpu.memory_space<any>>) target(%46 : memref<32xf32, #tpu.memory_space<vmem>>) target_semaphore(%48 : memref<!tpu.dma_semaphore, #tpu.memory_space<semaphore_mem>>)
    %49 = arith.addi %0, %4 : i32
    %c4_i32 = arith.constant 4 : i32
    %50 = arith.addi %49, %c4_i32 : i32
    %51 = arith.index_cast %50 : i32 to index
    %52 = memref.load %arg1[%51] : memref<16xi32, #tpu.memory_space<smem>>
    %c4_i32_20 = arith.constant 4 : i32
    %53 = arith.addi %4, %c4_i32_20 : i32
    %c0_i32_21 = arith.constant 0 : i32
    %c0_i32_22 = arith.constant 0 : i32
    %54 = tpu.memref_slice %arg2[%52, %c0_i32_22] : memref<64x32xf32, #tpu.memory_space<any>> -> memref<1x32xf32, #tpu.memory_space<any>>
    %55 = tpu.memref_squeeze %54 : memref<1x32xf32, #tpu.memory_space<any>> -> memref<32xf32, #tpu.memory_space<any>>
    %c0_i32_23 = arith.constant 0 : i32
    %56 = tpu.memref_slice %arg9[%53, %c0_i32_23] : memref<8x32xf32, #tpu.memory_space<vmem>> -> memref<1x32xf32, #tpu.memory_space<vmem>>
    %57 = tpu.memref_squeeze %56 : memref<1x32xf32, #tpu.memory_space<vmem>> -> memref<32xf32, #tpu.memory_space<vmem>>
    %58 = tpu.memref_slice %arg10[%c0_i32_21] : memref<1x!tpu.dma_semaphore, #tpu.memory_space<semaphore_mem>> -> memref<1x!tpu.dma_semaphore, #tpu.memory_space<semaphore_mem>>
    %59 = tpu.memref_squeeze %58 : memref<1x!tpu.dma_semaphore, #tpu.memory_space<semaphore_mem>> -> memref<!tpu.dma_semaphore, #tpu.memory_space<semaphore_mem>>
    tpu.enqueue_dma source(%55 : memref<32xf32, #tpu.memory_space<any>>) target(%57 : memref<32xf32, #tpu.memory_space<vmem>>) target_semaphore(%59 : memref<!tpu.dma_semaphore, #tpu.memory_space<semaphore_mem>>)
    %60 = arith.addi %0, %4 : i32
    %c5_i32 = arith.constant 5 : i32
    %61 = arith.addi %60, %c5_i32 : i32
    %62 = arith.index_cast %61 : i32 to index
    %63 = memref.load %arg1[%62] : memref<16xi32, #tpu.memory_space<smem>>
    %c5_i32_24 = arith.constant 5 : i32
    %64 = arith.addi %4, %c5_i32_24 : i32
    %c0_i32_25 = arith.constant 0 : i32
    %c0_i32_26 = arith.constant 0 : i32
    %65 = tpu.memref_slice %arg2[%63, %c0_i32_26] : memref<64x32xf32, #tpu.memory_space<any>> -> memref<1x32xf32, #tpu.memory_space<any>>
    %66 = tpu.memref_squeeze %65 : memref<1x32xf32, #tpu.memory_space<any>> -> memref<32xf32, #tpu.memory_space<any>>
    %c0_i32_27 = arith.constant 0 : i32
    %67 = tpu.memref_slice %arg9[%64, %c0_i32_27] : memref<8x32xf32, #tpu.memory_space<vmem>> -> memref<1x32xf32, #tpu.memory_space<vmem>>
    %68 = tpu.memref_squeeze %67 : memref<1x32xf32, #tpu.memory_space<vmem>> -> memref<32xf32, #tpu.memory_space<vmem>>
    %69 = tpu.memref_slice %arg10[%c0_i32_25] : memref<1x!tpu.dma_semaphore, #tpu.memory_space<semaphore_mem>> -> memref<1x!tpu.dma_semaphore, #tpu.memory_space<semaphore_mem>>
    %70 = tpu.memref_squeeze %69 : memref<1x!tpu.dma_semaphore, #tpu.memory_space<semaphore_mem>> -> memref<!tpu.dma_semaphore, #tpu.memory_space<semaphore_mem>>
    tpu.enqueue_dma source(%66 : memref<32xf32, #tpu.memory_space<any>>) target(%68 : memref<32xf32, #tpu.memory_space<vmem>>) target_semaphore(%70 : memref<!tpu.dma_semaphore, #tpu.memory_space<semaphore_mem>>)
    %71 = arith.addi %0, %4 : i32
    %c6_i32 = arith.constant 6 : i32
    %72 = arith.addi %71, %c6_i32 : i32
    %73 = arith.index_cast %72 : i32 to index
    %74 = memref.load %arg1[%73] : memref<16xi32, #tpu.memory_space<smem>>
    %c6_i32_28 = arith.constant 6 : i32
    %75 = arith.addi %4, %c6_i32_28 : i32
    %c0_i32_29 = arith.constant 0 : i32
    %c0_i32_30 = arith.constant 0 : i32
    %76 = tpu.memref_slice %arg2[%74, %c0_i32_30] : memref<64x32xf32, #tpu.memory_space<any>> -> memref<1x32xf32, #tpu.memory_space<any>>
    %77 = tpu.memref_squeeze %76 : memref<1x32xf32, #tpu.memory_space<any>> -> memref<32xf32, #tpu.memory_space<any>>
    %c0_i32_31 = arith.constant 0 : i32
    %78 = tpu.memref_slice %arg9[%75, %c0_i32_31] : memref<8x32xf32, #tpu.memory_space<vmem>> -> memref<1x32xf32, #tpu.memory_space<vmem>>
    %79 = tpu.memref_squeeze %78 : memref<1x32xf32, #tpu.memory_space<vmem>> -> memref<32xf32, #tpu.memory_space<vmem>>
    %80 = tpu.memref_slice %arg10[%c0_i32_29] : memref<1x!tpu.dma_semaphore, #tpu.memory_space<semaphore_mem>> -> memref<1x!tpu.dma_semaphore, #tpu.memory_space<semaphore_mem>>
    %81 = tpu.memref_squeeze %80 : memref<1x!tpu.dma_semaphore, #tpu.memory_space<semaphore_mem>> -> memref<!tpu.dma_semaphore, #tpu.memory_space<semaphore_mem>>
    tpu.enqueue_dma source(%77 : memref<32xf32, #tpu.memory_space<any>>) target(%79 : memref<32xf32, #tpu.memory_space<vmem>>) target_semaphore(%81 : memref<!tpu.dma_semaphore, #tpu.memory_space<semaphore_mem>>)
    %82 = arith.addi %0, %4 : i32
    %c7_i32 = arith.constant 7 : i32
    %83 = arith.addi %82, %c7_i32 : i32
    %84 = arith.index_cast %83 : i32 to index
    %85 = memref.load %arg1[%84] : memref<16xi32, #tpu.memory_space<smem>>
    %c7_i32_32 = arith.constant 7 : i32
    %86 = arith.addi %4, %c7_i32_32 : i32
    %c0_i32_33 = arith.constant 0 : i32
    %c0_i32_34 = arith.constant 0 : i32
    %87 = tpu.memref_slice %arg2[%85, %c0_i32_34] : memref<64x32xf32, #tpu.memory_space<any>> -> memref<1x32xf32, #tpu.memory_space<any>>
    %88 = tpu.memref_squeeze %87 : memref<1x32xf32, #tpu.memory_space<any>> -> memref<32xf32, #tpu.memory_space<any>>
    %c0_i32_35 = arith.constant 0 : i32
    %89 = tpu.memref_slice %arg9[%86, %c0_i32_35] : memref<8x32xf32, #tpu.memory_space<vmem>> -> memref<1x32xf32, #tpu.memory_space<vmem>>
    %90 = tpu.memref_squeeze %89 : memref<1x32xf32, #tpu.memory_space<vmem>> -> memref<32xf32, #tpu.memory_space<vmem>>
    %91 = tpu.memref_slice %arg10[%c0_i32_33] : memref<1x!tpu.dma_semaphore, #tpu.memory_space<semaphore_mem>> -> memref<1x!tpu.dma_semaphore, #tpu.memory_space<semaphore_mem>>
    %92 = tpu.memref_squeeze %91 : memref<1x!tpu.dma_semaphore, #tpu.memory_space<semaphore_mem>> -> memref<!tpu.dma_semaphore, #tpu.memory_space<semaphore_mem>>
    tpu.enqueue_dma source(%88 : memref<32xf32, #tpu.memory_space<any>>) target(%90 : memref<32xf32, #tpu.memory_space<vmem>>) target_semaphore(%92 : memref<!tpu.dma_semaphore, #tpu.memory_space<semaphore_mem>>)
    %c1_i32_36 = arith.constant 1 : i32
    %c0 = arith.constant 0 : index
    %c0_37 = arith.constant 0 : index
    %93 = vector.load %arg4[%c0, %c0_37] : memref<8x1xi32, #tpu.memory_space<vmem>>, vector<8x1xi32>
    %c1 = arith.constant 1 : index
    %c0_38 = arith.constant 0 : index
    %94 = vector.load %arg5[%c1, %c0_38] : memref<2x32xf32, #tpu.memory_space<vmem>>, vector<1x32xf32>
    %95 = vector.shape_cast %94 : vector<1x32xf32> to vector<32xf32>
    %96 = vector.shape_cast %95 : vector<32xf32> to vector<1x32xf32>
    %97 = vector.shape_cast %96 : vector<1x32xf32> to vector<1x32xf32>
    %98 = vector.broadcast %97 : vector<1x32xf32> to vector<8x32xf32>
    %c0_39 = arith.constant 0 : index
    %c0_40 = arith.constant 0 : index
    %99 = vector.load %arg5[%c0_39, %c0_40] : memref<2x32xf32, #tpu.memory_space<vmem>>, vector<1x32xf32>
    %100 = vector.shape_cast %99 : vector<1x32xf32> to vector<32xf32>
    %101 = vector.shape_cast %100 : vector<32xf32> to vector<1x32xf32>
    %c0_i32_41 = arith.constant 0 : i32
    %102 = vector.broadcast %c0_i32_41 : i32 to vector<8x1xi32>
    %103 = arith.cmpi eq, %93, %102 : vector<8x1xi32>
    %104 = vector.shape_cast %103 : vector<8x1xi1> to vector<8x1xi1>
    %105 = vector.broadcast %104 : vector<8x1xi1> to vector<8x32xi1>
    %106 = vector.shape_cast %101 : vector<1x32xf32> to vector<1x32xf32>
    %107 = vector.broadcast %106 : vector<1x32xf32> to vector<8x32xf32>
    %108 = arith.select %105, %107, %98 : vector<8x32xi1>, vector<8x32xf32>
    %c0_42 = arith.constant 0 : index
    %c0_43 = arith.constant 0 : index
    %109 = vector.load %arg3[%c0_42, %c0_43] : memref<8x32xf32, #tpu.memory_space<vmem>>, vector<8x32xf32>
    %110 = arith.addf %108, %109 : vector<8x32xf32>
    %c0_i32_44 = arith.constant 0 : i32
    %c0_i32_45 = arith.constant 0 : i32
    %c0_i32_46 = arith.constant 0 : i32
    %111 = tpu.memref_slice %arg2[%c0_i32_45, %c0_i32_46] : memref<64x32xf32, #tpu.memory_space<any>> -> memref<8x32xf32, #tpu.memory_space<any>>
    %112 = tpu.memref_slice %arg10[%c0_i32_44] : memref<1x!tpu.dma_semaphore, #tpu.memory_space<semaphore_mem>> -> memref<1x!tpu.dma_semaphore, #tpu.memory_space<semaphore_mem>>
    %113 = tpu.memref_squeeze %112 : memref<1x!tpu.dma_semaphore, #tpu.memory_space<semaphore_mem>> -> memref<!tpu.dma_semaphore, #tpu.memory_space<semaphore_mem>>
    tpu.wait_dma2 semaphore(%113 : memref<!tpu.dma_semaphore, #tpu.memory_space<semaphore_mem>>) src(%111 : memref<8x32xf32, #tpu.memory_space<any>>) dst(%arg9 : memref<8x32xf32, #tpu.memory_space<vmem>>)
    %c0_47 = arith.constant 0 : index
    %c0_48 = arith.constant 0 : index
    %114 = vector.load %arg9[%c0_47, %c0_48] : memref<8x32xf32, #tpu.memory_space<vmem>>, vector<8x32xf32>
    %115 = arith.addf %114, %110 : vector<8x32xf32>
    %cst = arith.constant dense<0.000000e+00> : vector<8xf32>
    %116 = vector.multi_reduction <add>, %115, %cst [1] : vector<8x32xf32> to vector<8xf32>
    %117 = vector.shape_cast %116 : vector<8xf32> to vector<8x1xf32>
    %cst_49 = arith.constant 3.200000e+01 : f32
    %118 = vector.broadcast %cst_49 : f32 to vector<8x1xf32>
    %119 = arith.divf %117, %118 : vector<8x1xf32>
    %120 = vector.broadcast %119 : vector<8x1xf32> to vector<8x32xf32>
    %121 = arith.subf %115, %120 : vector<8x32xf32>
    %122 = arith.mulf %121, %121 : vector<8x32xf32>
    %cst_50 = arith.constant dense<0.000000e+00> : vector<8xf32>
    %123 = vector.multi_reduction <add>, %122, %cst_50 [1] : vector<8x32xf32> to vector<8xf32>
    %124 = vector.shape_cast %123 : vector<8xf32> to vector<8x1xf32>
    %cst_51 = arith.constant 3.200000e+01 : f32
    %125 = vector.broadcast %cst_51 : f32 to vector<8x1xf32>
    %126 = arith.divf %124, %125 : vector<8x1xf32>
    %cst_52 = arith.constant 9.99999996E-13 : f32
    %127 = vector.broadcast %cst_52 : f32 to vector<8x1xf32>
    %128 = arith.addf %126, %127 : vector<8x1xf32>
    %129 = math.rsqrt %128 : vector<8x1xf32>
    %130 = vector.broadcast %129 : vector<8x1xf32> to vector<8x32xf32>
    %131 = arith.mulf %121, %130 : vector<8x32xf32>
    %c0_53 = arith.constant 0 : index
    %c0_54 = arith.constant 0 : index
    %132 = vector.load %arg6[%c0_53, %c0_54] : memref<1x32xf32, #tpu.memory_space<vmem>>, vector<1x32xf32>
    %133 = vector.broadcast %132 : vector<1x32xf32> to vector<8x32xf32>
    %134 = arith.mulf %131, %133 : vector<8x32xf32>
    %c0_55 = arith.constant 0 : index
    %c0_56 = arith.constant 0 : index
    %135 = vector.load %arg7[%c0_55, %c0_56] : memref<1x32xf32, #tpu.memory_space<vmem>>, vector<1x32xf32>
    %136 = vector.broadcast %135 : vector<1x32xf32> to vector<8x32xf32>
    %137 = arith.addf %134, %136 : vector<8x32xf32>
    %c0_57 = arith.constant 0 : index
    %c0_58 = arith.constant 0 : index
    %138 = vector.load %arg8[%c0_57, %c0_58] : memref<8x32xf32, #tpu.memory_space<vmem>>, vector<8x32xf32>
    tpu.vector_store %arg8[%c0_57, %c0_58], %137 {strides = array<i32>} : memref<8x32xf32, #tpu.memory_space<vmem>>, vector<8x32xf32>,
    return
  }
  func.func @transform_1(%arg0: i32, %arg1: memref<16xi32, #tpu.memory_space<smem>>) -> (i32, i32) {
    %c1_i32 = arith.constant 1 : i32
    %c0_i32 = arith.constant 0 : i32
    %0 = arith.cmpi eq, %c1_i32, %c0_i32 : i32
    %c1_i32_0 = arith.constant 1 : i32
    %1 = arith.select %0, %c1_i32_0, %c1_i32 : i32
    %2 = arith.remsi %arg0, %1 : i32
    %c0_i32_1 = arith.constant 0 : i32
    %3 = arith.cmpi ne, %2, %c0_i32_1 : i32
    %c0_i32_2 = arith.constant 0 : i32
    %4 = arith.cmpi slt, %2, %c0_i32_2 : i32
    %c0_i32_3 = arith.constant 0 : i32
    %5 = arith.cmpi slt, %1, %c0_i32_3 : i32
    %6 = arith.xori %4, %5 : i1
    %7 = arith.andi %6, %3 : i1
    %8 = arith.addi %2, %1 : i32
    %9 = arith.select %7, %8, %2 : i32
    %c0_i32_4 = arith.constant 0 : i32
    %c0_i32_5 = arith.constant 0 : i32
    return %9, %c0_i32_4 : i32, i32
  }
  func.func @transform_2(%arg0: i32, %arg1: memref<16xi32, #tpu.memory_space<smem>>) -> (i32, i32) {
    %c0_i32 = arith.constant 0 : i32
    %c0_i32_0 = arith.constant 0 : i32
    return %arg0, %c0_i32 : i32, i32
  }
  func.func @transform_3(%arg0: i32, %arg1: memref<16xi32, #tpu.memory_space<smem>>) -> (i32, i32) {
    %c0_i32 = arith.constant 0 : i32
    %c0_i32_0 = arith.constant 0 : i32
    %c0_i32_1 = arith.constant 0 : i32
    return %c0_i32, %c0_i32_0 : i32, i32
  }
  func.func @transform_4(%arg0: i32, %arg1: memref<16xi32, #tpu.memory_space<smem>>) -> (i32, i32) {
    %c0_i32 = arith.constant 0 : i32
    %c0_i32_0 = arith.constant 0 : i32
    %c0_i32_1 = arith.constant 0 : i32
    return %c0_i32, %c0_i32_0 : i32, i32
  }
  func.func @transform_5(%arg0: i32, %arg1: memref<16xi32, #tpu.memory_space<smem>>) -> (i32, i32) {
    %c0_i32 = arith.constant 0 : i32
    %c0_i32_0 = arith.constant 0 : i32
    %c0_i32_1 = arith.constant 0 : i32
    return %c0_i32, %c0_i32_0 : i32, i32
  }
  func.func @transform_6(%arg0: i32, %arg1: memref<16xi32, #tpu.memory_space<smem>>) -> (i32, i32) {
    %c0_i32 = arith.constant 0 : i32
    %c0_i32_0 = arith.constant 0 : i32
    return %arg0, %c0_i32 : i32, i32
  }
}

</mosaic_0001>

<bundles_post_ra>
// kernel: tpu_custom_call.1
= control target key start
LH: loop header
LB: loop body
LE: loop exit
PB: predicated region body
PF: predicated region fallthrough
CT: control target
= control target key end

     0   :  { %s872_s27 = smov [#allocation5]   ;;  %s1064_s0 = inlined_call_operand.vmem [shape: s32[16], index: 0, kind: input, shape index: {}]   ;;  %s1065_s1 = inlined_call_operand.vmem [shape: f32[64,32], index: 1, kind: input, shape index: {}]   ;;  %s1066_s2 = inlined_call_operand.vmem [shape: f32[8,32], index: 2, kind: input, shape index: {}]   ;;  %s1067_s3 = inlined_call_operand.vmem [shape: s32[16,1], index: 3, kind: input, shape index: {}]   ;;  %s1068_s4 = inlined_call_operand.vmem [shape: f32[2,32], index: 4, kind: input, shape index: {}]   ;;  %s1069_s5 = inlined_call_operand.vmem [shape: f32[1,32], index: 5, kind: input, shape index: {}]   ;;  %s1070_s6 = inlined_call_operand.vmem [shape: f32[1,32], index: 6, kind: input, shape index: {}]   ;;  %s1071_s7 = inlined_call_operand.hbm [shape: f32[16,32], index: 7, kind: output, shape index: {}]  }
   0x1   :  { %s13_s26 = sshll.u32 %s1064_s0, 4  ;;  %s14_s26 = int_to_ptr.vmem [resolvable:$true] %s13_s26 }
   0x2   :  { %16 = dma.vmem_to_smem %s14_s26, 16, %s872_s27, [#allocation4] }
   0x3   :  { %848 = dma.done.wait [#allocation4], 16 }
   0x4   :  { %849 = vsyncadd [#allocation4], 4294967280 }
   0x5   :  { %19 = sfence }
   0x6   :  { %20 = vsyncpa [#allocation7], 0 }
   0x7   :  { %22 = vsyncpa [#allocation7 + $0x1], 0  ;;  %s918_s28 = smov 0   ;;  %s920_s29 = smov 0  }
   0x8   :  { %s922_s30 = smov 0   ;;  %s924_s8 = smov 0  }
   0x9 LB: > { %s728_s0 = sadd.s32 4294967295, %s870_s8   ;;  %s729_s9 = sadd.s32 4294967294, %s870_s8   ;;  %s870_s8 = sphi %s924_s8, %s1081_s8   ;;  %s866_s30 = sphi %s922_s30, %s1080_s30   ;;  %s862_s29 = sphi %s920_s29, %s1079_s29   ;;  %s858_s28 = sphi %s918_s28, %s1078_s28  }
   0xa   : > { %s941_s10 = sadd.s32 1, %s870_s8   ;;  %s145_s11 = sadd.s32 1, %s866_s30 }
   0xb   : > { %s142_s12 = ssub.s32 %s870_s8, %s941_s10  ;;  %p155_p0 = scmp.ne.s32.totalorder %s866_s30, %s862_s29 }
   0xc   : > { %p143_p1 = scmp.eq.s32.totalorder %s142_s12, 0  ;;  %p156_p2 = scmp.eq.s32.totalorder %s728_s0, 1 }
   0xd   : > { %p161_p3 = scmp.ne.s32.totalorder %s862_s29, %s858_s28  ;;  %p162_p4 = scmp.eq.s32.totalorder %s729_s9, 1 }
   0xe   : > { %s951_s13 = scalar_select %p143_p1, %s866_s30, %s145_s11  }
   0xf   : > { %p953_p5 = por %p156_p2, %p155_p0  ;;  %p957_p6 = por %p162_p4, %p161_p3 }
  0x10   : > { %p732_p7 = scmp.ge.s32.totalorder %s870_s8, 1  ;;  %p199_p8 = scmp.lt.s32.totalorder %s870_s8, 3 }
  0x12   : > { %p200_p9 = pnand %p732_p7, %p199_p8 }
  0x13   : > { %s1072_s16 = sand.u32 (!%p200_p9), 1, %s862_s29   ;;  %p226_p10 = scmp.lt.s32.totalorder (!%p200_p9), %s728_s0, 1 }
  0x14   : > { %203 = sbr.rel (%p200_p9) target bundleno = 494 (0x1ee), region = 40  ;;  %s966_s17 = sshll.u32 (!%p200_p9), %s1072_s16, 3 }
  0x15   : > { %s968_s18 = sshll.u32 (!%p200_p9), %s728_s0, 3 }
  0x16   : > { %s232_s19 = sld [smem:[#allocation5 + %s968_s18]] (!%p200_p9) }
  0x19   : > { %s1083_s0 = smov (!%p226_p10, %s728_s0), 1 }
  0x1a   : > { %s734_s20 = sshll.u32 %s1083_s0, 3 }
  0x1b   : > { %s974_s23 = scalar_lea.vmem %s1067_s3, %s734_s20 }
  0x1c   : > { %s233_s26 = scalar_lea.vmem %s1065_s1, %s232_s19 }
  0x1d   : > { %v248_v0 = vld [vmem:[%s233_s26] sm:$0x1] }
  0x1e   : > { %249 = vst [vmem:[#allocation2] sm:$0x1] %v248_v0 }
  0x1f   : > { %267 = vsyncadd [#allocation3], 16  ;;  %s268_s9 = sadd.s32 1, %s968_s18 }
  0x20   : > { %s269_s11 = sld [smem:[#allocation5 + %s268_s9]] }
  0x26   : > { %s271_s0 = scalar_lea.vmem %s1065_s1, %s269_s11 }
  0x27   : > { %v287_v1 = vld [vmem:[%s271_s0] sm:$0x1] }
  0x28   : > { %288 = vst [vmem:[#allocation2 + $0x1] sm:$0x1] %v287_v1 }
  0x29   : > { %306 = vsyncadd [#allocation3], 16  ;;  %s307_s20 = sadd.s32 2, %s968_s18 }
  0x2a   : > { %s308_s21 = sld [smem:[#allocation5 + %s307_s20]] }
  0x30   : > { %s310_s19 = scalar_lea.vmem %s1065_s1, %s308_s21 }
  0x31   : > { %v326_v2 = vld [vmem:[%s310_s19] sm:$0x1] }
  0x32   : > { %327 = vst [vmem:[#allocation2 + $0x2] sm:$0x1] %v326_v2 }
  0x33   : > { %345 = vsyncadd [#allocation3], 16  ;;  %s346_s25 = sadd.s32 3, %s968_s18 }
  0x34   : > { %s347_s26 = sld [smem:[#allocation5 + %s346_s25]] }
  0x3a   : > { %s349_s16 = scalar_lea.vmem %s1065_s1, %s347_s26 }
  0x3b   : > { %v365_v3 = vld [vmem:[%s349_s16] sm:$0x1] }
  0x3c   : > { %366 = vst [vmem:[#allocation2 + $0x3] sm:$0x1] %v365_v3 }
  0x3d   : > { %384 = vsyncadd [#allocation3], 16  ;;  %s385_s11 = sadd.s32 4, %s968_s18 }
  0x3e   : > { %s386_s12 = sld [smem:[#allocation5 + %s385_s11]] }
  0x44   : > { %s388_s21 = scalar_lea.vmem %s1065_s1, %s386_s12 }
  0x45   : > { %v404_v4 = vld [vmem:[%s388_s21] sm:$0x1] }
  0x46   : > { %405 = vst [vmem:[#allocation2 + $0x4] sm:$0x1] %v404_v4 }
  0x47   : > { %423 = vsyncadd [#allocation3], 16  ;;  %s424_s22 = sadd.s32 5, %s968_s18 }
  0x48   : > { %s425_s24 = sld [smem:[#allocation5 + %s424_s22]] }
  0x4e   : > { %s427_s27 = scalar_lea.vmem %s1065_s1, %s425_s24 }
  0x4f   : > { %v443_v5 = vld [vmem:[%s427_s27] sm:$0x1] }
  0x50   : > { %444 = vst [vmem:[#allocation2 + $0x5] sm:$0x1] %v443_v5 }
  0x51   : > { %462 = vsyncadd [#allocation3], 16  ;;  %s463_s26 = sadd.s32 6, %s968_s18 }
  0x52   : > { %s464_s9 = sld [smem:[#allocation5 + %s463_s26]] }
  0x58   : > { %s466_s12 = scalar_lea.vmem %s1065_s1, %s464_s9 }
  0x59   : > { %v482_v6 = vld [vmem:[%s466_s12] sm:$0x1] }
  0x5a   : > { %483 = vst [vmem:[#allocation2 + $0x6] sm:$0x1] %v482_v6 }
  0x5b   : > { %501 = vsyncadd [#allocation3], 16  ;;  %s502_s0 = sadd.s32 7, %s968_s18  ;;  %v541_v8 = vld [vmem:[%s974_s23] sm:$0xff]  ;;  %v873_v9 = vmov 0  }
  0x5c   : > { %s503_s20 = sld [smem:[#allocation5 + %s502_s0]]  ;;  %783 = vset.pattern.permute.xlu0 %v873_v9  ;;  %vm545_vm0 = vcmp.eq.s32.totalorder %v541_v8, 0 }
  0x5d   : > { %v546_v10 = vsel %vm545_vm0, 1, %v873_v9 }
  0x62   : > { %s505_s24 = scalar_lea.vmem %s1065_s1, %s503_s20 }
  0x63   : > { %v521_v7 = vld [vmem:[%s505_s24] sm:$0x1] }
  0x64   : > { %522 = vst [vmem:[#allocation2 + $0x7] sm:$0x1] %v521_v7 }
  0x65   : > { %540 = vsyncadd [#allocation3], 16  ;;  %548 = vperm.xlu0 %783, %v546_v10   ;;  %v784_v11 = vld [vmem:[%s1068_s4 + $0x1] ss:$0 sm:$0xff]  ;;  %v785_v12 = vld [vmem:[%s1068_s4] ss:$0 sm:$0xff] }
  0x66   : > { %v553_v13 = vld [vmem:[%s1066_s2] sm:$0xff] }
  0xd7   : > { %v549_v14 = vpop.permute.xlu0 %548 }
  0xd8   : > { %vm550_vm1 = vcmp.eq.s32.totalorder %v549_v14, 1 }
  0xd9   : > { %v552_v15 = vsel %vm550_vm1, %v785_v12, %v784_v11 }
  0xda   : > { %v554_v16 = vadd.f32 %v553_v13, %v552_v15 }
  0xdb   : > { %850 = dma.done.wait [#allocation3], 128 }
  0xdc   : > { %851 = vsyncadd [#allocation3], 4294967168  ;;  %v558_v17 = vld [vmem:[#allocation2] sm:$0xff]  ;;  %vm560_vm2 = vcmask 261120   ;;  %v874_v20 = vmov 32.0   ;;  %s612_s20 = scalar_lea.hbm %s1071_s7, %s968_s18  ;;  %s1075_s24 = scalar_lea.vmem [#allocation6], %s966_s17 }
  0xdd   : > { %v559_v18 = vadd.f32 %v558_v17, %v554_v16  ;;  %788 = vrcp.f32 %v874_v20  ;;  %v786_v41 = vld [vmem:[%s1069_s5] ss:$0 sm:$0xff]  ;;  %s614_s19 = sshll.u32 %s1075_s24, 4  ;;  %s616_s25 = sshll.u32 %s612_s20, 4  ;;  %s615_s19 = int_to_ptr.vmem [resolvable:$true] %s614_s19  ;;  %s617_s25 = int_to_ptr.hbm [resolvable:$true] %s616_s25 }
  0xde   : > { %v787_v44 = vld [vmem:[%s1070_s6] ss:$0 sm:$0xff]  ;;  %s1076_s27 = smov %s1075_s24  ;;  %s1077_s26 = sand.u32 1, %s862_s29  }
  0xdf   : > { %v561_v19 = vsel %vm560_vm2, %v559_v18, 0.0  ;;  %s602_s9 = scalar_lea.sflag [#allocation7], %s1077_s26  ;;  %s818_s18 = sshra.s32 %s617_s25, 4  ;;  %s819_s18 = int_to_ptr.hbm [resolvable:$true] %s818_s18 }
  0xe0   : > { %562 = vadd.xlane.f32.xlu0 %v561_v19  ;;  %s820_s16 = scalar_lea.hbm %s819_s18, 8  ;;  %s824_s12 = scalar_lea.hbm %s1071_s7, 16 }
  0xe1   : > { %p821_p11 = scmp.ne.s32.totalorder %s819_s18, %s820_s16  ;;  %p825_p0 = scmp.lt.s32.totalorder %s819_s18, %s1071_s7 }
  0xe2   : > { %p826_p1 = scmp.lt.s32.totalorder %s824_s12, %s820_s16 }
  0xe3   : > { %v789_v21 = vpop.eup %788  ;;  %p822_p12 = pnand %p821_p11, %p953_p5 }
  0xe4   : > { %v565_v22 = vmul.f32 32.0, %v789_v21  ;;  %vm569_vm3 = vweird.f32 %v789_v21  ;;  %p827_p2 = por %p826_p1, %p825_p0 }
  0xe5   : > { %p823_p13 = pneg %p822_p12 }
  0xe6   : > { %v566_v23 = vsub.f32 1.0, %v565_v22 }
  0xe7   : > { %p828_p3 = pnand %p827_p2, %p823_p13 }
  0xe8   : > { %v567_v24 = vmul.f32 %v789_v21, %v566_v23 }
  0xea   : > { %v568_v25 = vadd.f32 %v789_v21, %v567_v24 }
  0xec   : > { %v570_v26 = vsel %vm569_vm3, %v789_v21, %v568_v25 }
 0x153   : > { %v563_v27 = vpop.xlane.xlu0 %562 }
 0x154   : > { %v571_v28 = vmul.f32 %v570_v26, %v563_v27 }
 0x156   : > { %v572_v29 = vsub.f32 %v559_v18, %v571_v28 }
 0x158   : > { %v573_v30 = vmul.f32 %v572_v29, %v572_v29 }
 0x15a   : > { %v574_v31 = vsel %vm560_vm2, %v573_v30, 0.0 }
 0x15b   : > { %575 = vadd.xlane.f32.xlu0 %v574_v31 }
 0x1ce   : > { %v576_v32 = vpop.xlane.xlu0 %575 }
 0x1cf   : > { %v577_v33 = vmul.f32 %v576_v32, %v570_v26 }
 0x1d1   : > { %v578_v34 = vadd.f32 1e-12, %v577_v33 }
 0x1d3   : > { %790 = vrsqrt.f32 %v578_v34  ;;  %vm585_vm5 = vweird.f32 %v578_v34 }
 0x1d9   : > { %v791_v35 = vpop.eup %790 }
 0x1da   : > { %v580_v36 = vmul.f32 %v791_v35, %v578_v34  ;;  %vm586_vm4 = vweird.f32 %v791_v35 }
 0x1db   : > { %vm587_vm6 = vmor %vm585_vm5, %vm586_vm4 }
 0x1dc   : > { %v581_v37 = vmul.f32 %v791_v35, %v580_v36 }
 0x1de   : > { %v582_v38 = vmul.f32 0.5, %v581_v37 }
 0x1e0   : > { %v583_v39 = vsub.f32 1.5, %v582_v38 }
 0x1e2   : > { %v584_v40 = vmul.f32 %v791_v35, %v583_v39 }
 0x1e4   : > { %v588_v42 = vsel %vm587_vm6, %v791_v35, %v584_v40 }
 0x1e5   : > { %v589_v43 = vmul.f32 %v588_v42, %v572_v29 }
 0x1e7   : > { %v594_v45 = vmul.f32 %v786_v41, %v589_v43 }
 0x1e9   : > { %v599_v46 = vadd.f32 %v787_v44, %v594_v45 }
 0x1eb   : > { %600 = vst.msk [vmem:[%s1076_s27] sm:$0xff] %vm560_vm2, %v599_v46 }
 0x1ec   : > { %831 = shalt.err (!%p828_p3)
}
 0x1ed   : > { %741 = dma.vmem_to_hbm [thread:$0]  (%p953_p5), %s615_s19, 128, %s617_s25, %s602_s9  }
 0x1ee PF: > { %p747_p4 = scmp.ge.s32.totalorder %s870_s8, 2  ;;  %s628_s17 = sand.u32 1, %s858_s28  }
 0x1ef   : > { %s629_s21 = scalar_lea.sflag [#allocation7], %s628_s17 }
 0x1f0   : > { %p744_p7 = pnand %p747_p4, %p957_p6 }
 0x1f2   : > { %p745_p8 = pneg %p744_p7 }
 0x1f4   : > { %853 = dma.done.wait (%p745_p8), %s629_s21, 128  }
 0x1f5   : > { %855 = vsyncadd (%p745_p8), %s629_s21, 4294967168  ;;  %p25_p9 = scmp.ge.s32.totalorder %s941_s10, 4   ;;  %s1078_s28 = smov %s862_s29 }
 0x1f6   : > { %s1079_s29 = smov %s866_s30  ;;  %s1080_s30 = smov %s951_s13 }
 0x1f7   : > { %s1081_s8 = smov %s941_s10  ;;  %27 = sbr.rel (!%p25_p9) target bundleno = 9 (0x9), region = 362 }
 0x1fc   :  { %635 = vsyncpa [#allocation7], 1 }
 0x1fd   :  { %637 = vsyncpa [#allocation7 + $0x1], 1 }
 0x1fe   :  { %638 = vsyncmov [#allocation3] }
 0x201   :  { %s639_s8 = vpop.sfrf %638 }
 0x202   :  { %p740_p5 = scmp.ne.s32.totalorder %s639_s8, 0 }
 0x204   :  { %643 = shalt.err (%p740_p5)  }

</bundles_post_ra>
